<compile_context>
chip_gen: v5e
topology: v5e:2x2
jax: 0.10.0
libtpu: 0.0.40
codegen_flags: <defaults>
</compile_context>

<pallas_src>
import functools

import jax
import jax.numpy as jnp
import numpy as np
from jax import lax
from jax.experimental import pallas as pl
from jax.experimental.pallas import tpu as pltpu

EPS = 1e-5  # PyTorch BatchNorm2d default eps


def seq_embed_kernel(a1_ref, m1_ref, w1t_ref, b1_ref, g1_ref, be1_ref,
                     w2t_ref, b2_ref, g2_ref, be2_ref,
                     wfct_ref, bfc_ref, smat_ref, rmat_ref, sl_ref,
                     out_ref, *, BN, T1, T2, E, CS):
    """conv1 -> pad -> relu -> bn1 -> conv2 -> pad -> relu -> bn2 -> adaptive_maxpool -> rel fc.

    All large activations are (channels, BN*time): channels on sublanes, the flattened
    (sequence, time) axis lane-dense. Column index = t * BN + bn (time-major)."""
    P1 = T1 + 4                       # layer-1 padded time length (frame of a1 / h1 columns)
    T2p = T2 + 4                      # layer-2 padded time length
    Tb = T2 * BN                      # number of valid conv2 output columns
    C4 = w2t_ref.shape[1]

    # ---- conv1 (wrapper pre-built padded im2col slab) + ReLU + BatchNorm1 ---------------------
    # Pad columns of a1 are exact zeros, so relu(conv)=0 there and the batch statistics over the
    # padded tensor need no correction (count == number of columns).
    y1 = jnp.dot(w1t_ref[...], a1_ref[...], preferred_element_type=jnp.float32)
    y1 = y1 + b1_ref[...] * m1_ref[...]            # bias only on body columns
    r1 = jnp.maximum(y1, 0.0)                      # (C2, P1*BN)
    inv1 = 1.0 / (P1 * BN)
    mu1 = jnp.sum(r1, axis=1, keepdims=True) * inv1
    d1 = r1 - mu1
    var1 = jnp.sum(d1 * d1, axis=1, keepdims=True) * inv1       # two-pass variance
    sc1 = lax.rsqrt(var1 + EPS) * g1_ref[...]
    h1 = d1 * sc1 + be1_ref[...]                   # padded + normalized activation (C2, P1*BN)

    # ---- conv2: CS per-tap dots on lane-shifted slices, f32 accumulation ----------------------
    acc = jnp.dot(w2t_ref[0], h1[:, 0:Tb], preferred_element_type=jnp.float32) + b2_ref[...]
    for k in range(1, CS):
        acc = acc + jnp.dot(w2t_ref[k], h1[:, k * BN:k * BN + Tb],
                            preferred_element_type=jnp.float32)
    r2 = jnp.maximum(acc, 0.0)                     # (C4, Tb) -- valid body columns only
    # BatchNorm2 over the padded activation: pads are relu(0)=0, folded analytically.
    inv2 = 1.0 / (T2p * BN)
    mu2 = jnp.sum(r2, axis=1, keepdims=True) * inv2
    d2 = r2 - mu2
    var2 = (jnp.sum(d2 * d2, axis=1, keepdims=True)
            + (T2p - T2) * BN * (mu2 * mu2)) * inv2
    sc2 = lax.rsqrt(var2 + EPS) * g2_ref[...]
    h2 = d2 * sc2 + be2_ref[...]                   # (C4, Tb)
    pad2 = be2_ref[...] - mu2 * sc2                # per-channel value of the (unmaterialized) pads

    # ---- AdaptiveMaxPool2d(E) over (channels=C4, padded time=T2p), unrolled windows -----------
    def win(i, size):
        return (i * size) // E, -((-(i + 1) * size) // E)

    hc_rows, pc_rows = [], []
    for wi in range(E):                            # channel windows: sublane slices + max
        c0, c1 = win(wi, C4)
        hc_rows.append(jnp.max(h2[c0:c1, :], axis=0, keepdims=True))
        pc_rows.append(jnp.max(pad2[c0:c1, :], axis=0, keepdims=True))
    hc = jnp.concatenate(hc_rows, axis=0)          # (E, Tb)
    pc = jnp.concatenate(pc_rows, axis=0)          # (E, 1)

    wcols = []
    for wj in range(E):                            # time windows over the padded length T2p
        lo, hi = win(wj, T2p)
        t0, t1 = max(lo - 2, 0), min(hi - 2, T2)   # body part of the window
        wmax = None
        for t in range(t0, t1):                    # running max over <=3 lane slices of width BN
            piece = hc[:, t * BN:(t + 1) * BN]
            wmax = piece if wmax is None else jnp.maximum(wmax, piece)
        if lo < 2 or hi > T2 + 2:                  # window touches the zero-pad region
            wmax = pc if wmax is None else jnp.maximum(wmax, pc)
        wcols.append(jnp.broadcast_to(wmax, (E, BN)))
    feats_t = jnp.concatenate(wcols, axis=0)       # (E*E, BN), row = wj*E + wi (wfct matches)

    # ---- relational head: fc_out + rel_rec/rel_send expansion as 0/1 matmuls ------------------
    psr = jnp.dot(wfct_ref[...], feats_t, preferred_element_type=jnp.float32)        # (4, BN)
    logits = (jnp.dot(psr[0:2, :], smat_ref[...], preferred_element_type=jnp.float32)
              + jnp.dot(psr[2:4, :], rmat_ref[...], preferred_element_type=jnp.float32)
              + bfc_ref[...])                      # (2, B*N*N), lane-dense
    out_ref[...] = jnp.maximum(logits, 0.0) + sl_ref[...] * 1e7


def sequence_embedding(x, params, *, num_nodes, embedding_dim, conv_size):
    """x: (B, num_nodes, seq_len, d_model) f32 -> (B, num_nodes, num_nodes, 2) f32."""
    B, N, T, d = x.shape
    assert N == num_nodes
    E, CS = embedding_dim, conv_size
    (w1, b1, g1, be1, w2, b2, g2, be2, _rel_rec, _rel_send, wfc, bfc, self_loop) = params
    C2, C4 = w1.shape[2], w2.shape[2]

    BN = B * N
    T1 = T - CS + 1                    # conv1 output length
    P1 = T1 + 4                        # after F.pad(..., (2, 2))
    T2 = P1 - CS + 1                   # conv2 output length
    T2p = T2 + 4
    EE = E * E
    assert E <= C4 and E <= T2p, "adaptive-pool windows must be non-empty"

    x2 = x.reshape(BN, T, d).astype(jnp.float32)

    # conv1 im2col slab, time-major flattened over the padded frame:
    #   a1[k*d + c, tp*BN + bn] = x[bn, (tp-2)+k, c] for body tp in [2, T1+2), zeros at pads.
    taps = jnp.stack([x2[:, k:k + T1, :] for k in range(CS)], axis=2)   # (BN, T1, CS, d)
    bodyp = jnp.pad(taps.reshape(BN, T1, CS * d), ((0, 0), (2, 2), (0, 0)))
    a1 = bodyp.transpose(2, 1, 0).reshape(CS * d, P1 * BN)

    m1np = np.zeros((1, P1 * BN), np.float32)
    m1np[0, 2 * BN:(T1 + 2) * BN] = 1.0            # body-column mask for the conv1 bias
    mask1 = jnp.asarray(m1np)

    # Weights / per-channel params in the transposed (channels-on-sublanes) layout.
    w1t = w1.reshape(CS * d, C2).T                 # (C2, CS*d)
    w2t = jnp.transpose(w2, (0, 2, 1))             # (CS, C4, C2)
    b1c, g1c, be1c = b1.reshape(C2, 1), g1.reshape(C2, 1), be1.reshape(C2, 1)
    b2c, g2c, be2c = b2.reshape(C4, 1), g2.reshape(C4, 1), be2.reshape(C4, 1)

    # fc_out weight: [send | recv] halves stacked on sublanes, transposed, and its E*E columns
    # permuted from channel-major (wi*E+wj) to the kernel's time-major pooled ordering (wj*E+wi).
    wfc_send = wfc[:EE].reshape(E, E, 2).transpose(1, 0, 2).reshape(EE, 2)
    wfc_recv = wfc[EE:].reshape(E, E, 2).transpose(1, 0, 2).reshape(EE, 2)
    wfct = jnp.concatenate([wfc_send.T, wfc_recv.T], axis=0)            # (4, EE)
    bfc_col = bfc.reshape(2, 1)

    # rel_send / rel_rec are one-hot, so the per-edge gather is two 0/1 expansion matmuls:
    #   logits[c, b*N*N + i*N + j] = send[c, b*N + j] + recv[c, b*N + i] + bfc[c]
    smat = np.zeros((BN, B * N * N), np.float32)
    rmat = np.zeros((BN, B * N * N), np.float32)
    for b in range(B):
        for i in range(N):
            for j in range(N):
                col = b * N * N + i * N + j
                smat[b * N + j, col] = 1.0
                rmat[b * N + i, col] = 1.0
    smat, rmat = jnp.asarray(smat), jnp.asarray(rmat)

    sl_cm = jnp.tile(jnp.transpose(self_loop, (2, 0, 1)).reshape(2, N * N), (1, B))  # (2, B*N*N)

    operands = (a1, mask1, w1t, b1c, g1c, be1c, w2t, b2c, g2c, be2c,
                wfct, bfc_col, smat, rmat, sl_cm)

    io_bytes = 4 * (sum(int(np.prod(o.shape)) for o in operands) + 2 * B * N * N)
    act_bytes = 4 * 6 * (C2 * P1 * BN + C4 * T2 * BN)   # a few live copies of the activations
    vmem_limit = int(max(2 * 1024 * 1024, 4 * (io_bytes + act_bytes)))

    flops = 2 * (C2 * CS * d * P1 * BN + CS * C4 * C2 * T2 * BN
                 + 4 * EE * BN + 2 * 2 * BN * B * N * N)

    kernel = functools.partial(seq_embed_kernel, BN=BN, T1=T1, T2=T2, E=E, CS=CS)

    # TODO(synk): for production B*N*T sizes, grid the BN axis ('parallel') with a two-pass (stats then apply) BatchNorm pipeline and real BlockSpecs; gridless here since everything fits in VMEM.
    out_cm = pl.pallas_call(
        kernel,
        out_shape=jax.ShapeDtypeStruct((2, B * N * N), jnp.float32),
        in_specs=[pl.BlockSpec(memory_space=pltpu.MemorySpace.VMEM)] * len(operands),
        out_specs=pl.BlockSpec(memory_space=pltpu.MemorySpace.VMEM),
        compiler_params=pltpu.CompilerParams(vmem_limit_bytes=vmem_limit),
        cost_estimate=pl.CostEstimate(flops=int(flops), transcendentals=int(C2 + C4),
                                      bytes_accessed=int(io_bytes)),
    )(*operands)

    return out_cm.reshape(2, B, N, N).transpose(1, 2, 3, 0)             # (B, N, N, 2)


def torch_reference(x, params, *, num_nodes, embedding_dim, conv_size):
    """Independent pure-JAX re-implementation mirroring the PyTorch module op-for-op
    (NCHW layout, lax.conv, explicit adaptive-pool windows, rel_rec/rel_send matmuls)."""
    (w1, b1, g1, be1, w2, b2, g2, be2, rel_rec, rel_send, wfc, bfc, self_loop) = params
    B, N, T, d = x.shape
    E, CS = embedding_dim, conv_size

    def conv(h, w, b):   # h: NCHW, w: (CS, Cin, Cout) -> torch layout (Cout, Cin, 1, CS)
        wt = jnp.transpose(w, (2, 1, 0))[:, :, None, :]
        y = lax.conv_general_dilated(h, wt, (1, 1), 'VALID',
                                     dimension_numbers=('NCHW', 'OIHW', 'NCHW'))
        return y + b.reshape(1, -1, 1, 1)

    def bn(h, g, be):
        m = jnp.mean(h, axis=(0, 2, 3), keepdims=True)
        v = jnp.var(h, axis=(0, 2, 3), keepdims=True)
        return (h - m) / jnp.sqrt(v + EPS) * g.reshape(1, -1, 1, 1) + be.reshape(1, -1, 1, 1)

    h = jnp.transpose(x, (0, 3, 1, 2))                            # (B, d, N, T)
    h = jnp.pad(conv(h, w1, b1), ((0, 0), (0, 0), (0, 0), (2, 2)))
    h = bn(jnp.maximum(h, 0.0), g1, be1)
    h = jnp.pad(conv(h, w2, b2), ((0, 0), (0, 0), (0, 0), (2, 2)))
    h = bn(jnp.maximum(h, 0.0), g2, be2)
    h = jnp.transpose(h, (0, 2, 1, 3))                            # (B, N, C4, T2p)
    C4, T2p = h.shape[2], h.shape[3]

    rows = []
    for i in range(E):                                            # AdaptiveMaxPool2d(E)
        c0, c1 = (i * C4) // E, -((-(i + 1) * C4) // E)
        cols = [jnp.max(h[:, :, c0:c1, (j * T2p) // E:-((-(j + 1) * T2p) // E)], axis=(2, 3))
                for j in range(E)]
        rows.append(jnp.stack(cols, axis=-1))                     # (B, N, E_time)
    feats = jnp.stack(rows, axis=2).reshape(B, N, E * E)          # channel-major flatten

    recv = jnp.einsum('pn,bnf->bpf', rel_rec, feats)
    send = jnp.einsum('pn,bnf->bpf', rel_send, feats)
    logits = jnp.concatenate([send, recv], axis=-1) @ wfc + bfc
    out = jnp.maximum(logits, 0.0).reshape(B, N, N, 2)
    return self_loop * 1e7 + out


def make_params(key, d_model, num_nodes, embedding_dim, conv_size):
    C2, C4 = 2 * d_model, 4 * d_model
    E, N = embedding_dim, num_nodes
    ks = jax.random.split(key, 10)
    w1 = 0.2 * jax.random.normal(ks[0], (conv_size, d_model, C2), jnp.float32)
    b1 = 0.1 * jax.random.normal(ks[1], (1, C2), jnp.float32)
    g1 = 1.0 + 0.1 * jax.random.normal(ks[2], (1, C2), jnp.float32)
    be1 = 0.1 * jax.random.normal(ks[3], (1, C2), jnp.float32)
    w2 = 0.2 * jax.random.normal(ks[4], (conv_size, C2, C4), jnp.float32)
    b2 = 0.1 * jax.random.normal(ks[5], (1, C4), jnp.float32)
    g2 = 1.0 + 0.1 * jax.random.normal(ks[6], (1, C4), jnp.float32)
    be2 = 0.1 * jax.random.normal(ks[7], (1, C4), jnp.float32)
    wfc = 0.2 * jax.random.normal(ks[8], (2 * E * E, 2), jnp.float32)
    bfc = 0.1 * jax.random.normal(ks[9], (1, 2), jnp.float32)

    # rel_rec / rel_send: off_diag = ones([N,N]) (diagonal included), one-hot of where() indices.
    idx = np.arange(N * N)
    rel_rec = jnp.asarray(np.eye(N, dtype=np.float32)[idx // N])   # (N*N, N)
    rel_send = jnp.asarray(np.eye(N, dtype=np.float32)[idx % N])   # (N*N, N)
    self_loop = jnp.stack([jnp.eye(N, dtype=jnp.float32),
                           jnp.zeros((N, N), jnp.float32)], axis=-1)  # (N, N, 2)
    return (w1, b1, g1, be1, w2, b2, g2, be2, rel_rec, rel_send, wfc, bfc, self_loop)


if __name__ == "__main__":
    d_model, num_nodes, embedding_dim, conv_size = 4, 8, 8, 4
    B, T = 2, 16

    key = jax.random.PRNGKey(0)
    kx, kp = jax.random.split(key)
    x = jax.random.normal(kx, (B, num_nodes, T, d_model), jnp.float32)
    params = make_params(kp, d_model, num_nodes, embedding_dim, conv_size)

    out = jax.block_until_ready(sequence_embedding(
        x, params, num_nodes=num_nodes, embedding_dim=embedding_dim, conv_size=conv_size))
    ref = jax.block_until_ready(torch_reference(
        x, params, num_nodes=num_nodes, embedding_dim=embedding_dim, conv_size=conv_size))

    assert out.shape == (B, num_nodes, num_nodes, 2)
    err = np.max(np.abs(np.asarray(out) - np.asarray(ref)))
    assert np.allclose(np.asarray(out), np.asarray(ref), rtol=1e-4, atol=2e-3), f"max|err|={err}"
    print("KERNEL_OK")
</pallas_src>

<mosaic_0001>
module attributes {stable_mosaic.version = 11 : i64} {
  func.func @seq_embed_kernel(%arg0: memref<16x272xf32, #tpu.memory_space<vmem>>, %arg1: memref<1x272xf32, #tpu.memory_space<vmem>>, %arg2: memref<8x16xf32, #tpu.memory_space<vmem>>, %arg3: memref<8x1xf32, #tpu.memory_space<vmem>>, %arg4: memref<8x1xf32, #tpu.memory_space<vmem>>, %arg5: memref<8x1xf32, #tpu.memory_space<vmem>>, %arg6: memref<4x16x8xf32, #tpu.memory_space<vmem>>, %arg7: memref<16x1xf32, #tpu.memory_space<vmem>>, %arg8: memref<16x1xf32, #tpu.memory_space<vmem>>, %arg9: memref<16x1xf32, #tpu.memory_space<vmem>>, %arg10: memref<4x64xf32, #tpu.memory_space<vmem>>, %arg11: memref<2x1xf32, #tpu.memory_space<vmem>>, %arg12: memref<16x128xf32, #tpu.memory_space<vmem>>, %arg13: memref<16x128xf32, #tpu.memory_space<vmem>>, %arg14: memref<2x128xf32, #tpu.memory_space<vmem>>, %arg15: memref<2x128xf32, #tpu.memory_space<vmem>>) attributes {dimension_semantics = [], scalar_prefetch = 0 : i64, scratch_operands = 0 : i64, tpu.core_type = #tpu.core_type<tc>} {
    %c0 = arith.constant 0 : index
    %c0_0 = arith.constant 0 : index
    %0 = vector.load %arg2[%c0, %c0_0] : memref<8x16xf32, #tpu.memory_space<vmem>>, vector<8x16xf32>
    %c0_1 = arith.constant 0 : index
    %c0_2 = arith.constant 0 : index
    %1 = vector.load %arg0[%c0_1, %c0_2] : memref<16x272xf32, #tpu.memory_space<vmem>>, vector<16x272xf32>
    %cst = arith.constant dense<0.000000e+00> : vector<8x272xf32>
    %2 = tpu.matmul %0, %1, %cst {dimension_numbers = #tpu.dot_dimension_numbers<[1], [0], [0], [1], [0, 0, 1, 1], [], []>} : vector<8x16xf32>, vector<16x272xf32>, vector<8x272xf32> -> vector<8x272xf32>
    %c0_3 = arith.constant 0 : index
    %c0_4 = arith.constant 0 : index
    %3 = vector.load %arg3[%c0_3, %c0_4] : memref<8x1xf32, #tpu.memory_space<vmem>>, vector<8x1xf32>
    %c0_5 = arith.constant 0 : index
    %c0_6 = arith.constant 0 : index
    %4 = vector.load %arg1[%c0_5, %c0_6] : memref<1x272xf32, #tpu.memory_space<vmem>>, vector<1x272xf32>
    %5 = vector.broadcast %3 : vector<8x1xf32> to vector<8x272xf32>
    %6 = vector.broadcast %4 : vector<1x272xf32> to vector<8x272xf32>
    %7 = arith.mulf %5, %6 : vector<8x272xf32>
    %8 = arith.addf %2, %7 : vector<8x272xf32>
    %cst_7 = arith.constant 0.000000e+00 : f32
    %9 = vector.broadcast %cst_7 : f32 to vector<8x272xf32>
    %10 = arith.maximumf %8, %9 : vector<8x272xf32>
    %cst_8 = arith.constant dense<0.000000e+00> : vector<8xf32>
    %11 = vector.multi_reduction <add>, %10, %cst_8 [1] : vector<8x272xf32> to vector<8xf32>
    %12 = vector.shape_cast %11 : vector<8xf32> to vector<8x1xf32>
    %cst_9 = arith.constant 0.0036764706 : f32
    %13 = vector.broadcast %cst_9 : f32 to vector<8x1xf32>
    %14 = arith.mulf %12, %13 : vector<8x1xf32>
    %15 = vector.broadcast %14 : vector<8x1xf32> to vector<8x272xf32>
    %16 = arith.subf %10, %15 : vector<8x272xf32>
    %17 = arith.mulf %16, %16 : vector<8x272xf32>
    %cst_10 = arith.constant dense<0.000000e+00> : vector<8xf32>
    %18 = vector.multi_reduction <add>, %17, %cst_10 [1] : vector<8x272xf32> to vector<8xf32>
    %19 = vector.shape_cast %18 : vector<8xf32> to vector<8x1xf32>
    %cst_11 = arith.constant 0.0036764706 : f32
    %20 = vector.broadcast %cst_11 : f32 to vector<8x1xf32>
    %21 = arith.mulf %19, %20 : vector<8x1xf32>
    %cst_12 = arith.constant 9.99999974E-6 : f32
    %22 = vector.broadcast %cst_12 : f32 to vector<8x1xf32>
    %23 = arith.addf %21, %22 : vector<8x1xf32>
    %24 = math.rsqrt %23 : vector<8x1xf32>
    %c0_13 = arith.constant 0 : index
    %c0_14 = arith.constant 0 : index
    %25 = vector.load %arg4[%c0_13, %c0_14] : memref<8x1xf32, #tpu.memory_space<vmem>>, vector<8x1xf32>
    %26 = arith.mulf %24, %25 : vector<8x1xf32>
    %27 = vector.broadcast %26 : vector<8x1xf32> to vector<8x272xf32>
    %28 = arith.mulf %16, %27 : vector<8x272xf32>
    %c0_15 = arith.constant 0 : index
    %c0_16 = arith.constant 0 : index
    %29 = vector.load %arg5[%c0_15, %c0_16] : memref<8x1xf32, #tpu.memory_space<vmem>>, vector<8x1xf32>
    %30 = vector.broadcast %29 : vector<8x1xf32> to vector<8x272xf32>
    %31 = arith.addf %28, %30 : vector<8x272xf32>
    %c0_17 = arith.constant 0 : index
    %c0_18 = arith.constant 0 : index
    %c0_19 = arith.constant 0 : index
    %32 = vector.load %arg6[%c0_17, %c0_18, %c0_19] : memref<4x16x8xf32, #tpu.memory_space<vmem>>, vector<1x16x8xf32>
    %33 = vector.shape_cast %32 : vector<1x16x8xf32> to vector<16x8xf32>
    %34 = vector.extract_strided_slice %31 {offsets = [0, 0], sizes = [8, 224], strides = [1, 1]} : vector<8x272xf32> to vector<8x224xf32>
    %cst_20 = arith.constant dense<0.000000e+00> : vector<16x224xf32>
    %35 = tpu.matmul %33, %34, %cst_20 {dimension_numbers = #tpu.dot_dimension_numbers<[1], [0], [0], [1], [0, 0, 1, 1], [], []>} : vector<16x8xf32>, vector<8x224xf32>, vector<16x224xf32> -> vector<16x224xf32>
    %c0_21 = arith.constant 0 : index
    %c0_22 = arith.constant 0 : index
    %36 = vector.load %arg7[%c0_21, %c0_22] : memref<16x1xf32, #tpu.memory_space<vmem>>, vector<16x1xf32>
    %37 = vector.broadcast %36 : vector<16x1xf32> to vector<16x224xf32>
    %38 = arith.addf %35, %37 : vector<16x224xf32>
    %c1 = arith.constant 1 : index
    %c0_23 = arith.constant 0 : index
    %c0_24 = arith.constant 0 : index
    %39 = vector.load %arg6[%c1, %c0_23, %c0_24] : memref<4x16x8xf32, #tpu.memory_space<vmem>>, vector<1x16x8xf32>
    %40 = vector.shape_cast %39 : vector<1x16x8xf32> to vector<16x8xf32>
    %41 = vector.extract_strided_slice %31 {offsets = [0, 16], sizes = [8, 224], strides = [1, 1]} : vector<8x272xf32> to vector<8x224xf32>
    %cst_25 = arith.constant dense<0.000000e+00> : vector<16x224xf32>
    %42 = tpu.matmul %40, %41, %cst_25 {dimension_numbers = #tpu.dot_dimension_numbers<[1], [0], [0], [1], [0, 0, 1, 1], [], []>} : vector<16x8xf32>, vector<8x224xf32>, vector<16x224xf32> -> vector<16x224xf32>
    %43 = arith.addf %38, %42 : vector<16x224xf32>
    %c2 = arith.constant 2 : index
    %c0_26 = arith.constant 0 : index
    %c0_27 = arith.constant 0 : index
    %44 = vector.load %arg6[%c2, %c0_26, %c0_27] : memref<4x16x8xf32, #tpu.memory_space<vmem>>, vector<1x16x8xf32>
    %45 = vector.shape_cast %44 : vector<1x16x8xf32> to vector<16x8xf32>
    %46 = vector.extract_strided_slice %31 {offsets = [0, 32], sizes = [8, 224], strides = [1, 1]} : vector<8x272xf32> to vector<8x224xf32>
    %cst_28 = arith.constant dense<0.000000e+00> : vector<16x224xf32>
    %47 = tpu.matmul %45, %46, %cst_28 {dimension_numbers = #tpu.dot_dimension_numbers<[1], [0], [0], [1], [0, 0, 1, 1], [], []>} : vector<16x8xf32>, vector<8x224xf32>, vector<16x224xf32> -> vector<16x224xf32>
    %48 = arith.addf %43, %47 : vector<16x224xf32>
    %c3 = arith.constant 3 : index
    %c0_29 = arith.constant 0 : index
    %c0_30 = arith.constant 0 : index
    %49 = vector.load %arg6[%c3, %c0_29, %c0_30] : memref<4x16x8xf32, #tpu.memory_space<vmem>>, vector<1x16x8xf32>
    %50 = vector.shape_cast %49 : vector<1x16x8xf32> to vector<16x8xf32>
    %51 = vector.extract_strided_slice %31 {offsets = [0, 48], sizes = [8, 224], strides = [1, 1]} : vector<8x272xf32> to vector<8x224xf32>
    %cst_31 = arith.constant dense<0.000000e+00> : vector<16x224xf32>
    %52 = tpu.matmul %50, %51, %cst_31 {dimension_numbers = #tpu.dot_dimension_numbers<[1], [0], [0], [1], [0, 0, 1, 1], [], []>} : vector<16x8xf32>, vector<8x224xf32>, vector<16x224xf32> -> vector<16x224xf32>
    %53 = arith.addf %48, %52 : vector<16x224xf32>
    %cst_32 = arith.constant 0.000000e+00 : f32
    %54 = vector.broadcast %cst_32 : f32 to vector<16x224xf32>
    %55 = arith.maximumf %53, %54 : vector<16x224xf32>
    %cst_33 = arith.constant dense<0.000000e+00> : vector<16xf32>
    %56 = vector.multi_reduction <add>, %55, %cst_33 [1] : vector<16x224xf32> to vector<16xf32>
    %57 = vector.shape_cast %56 : vector<16xf32> to vector<16x1xf32>
    %cst_34 = arith.constant 0.00347222225 : f32
    %58 = vector.broadcast %cst_34 : f32 to vector<16x1xf32>
    %59 = arith.mulf %57, %58 : vector<16x1xf32>
    %60 = vector.broadcast %59 : vector<16x1xf32> to vector<16x224xf32>
    %61 = arith.subf %55, %60 : vector<16x224xf32>
    %62 = arith.mulf %61, %61 : vector<16x224xf32>
    %cst_35 = arith.constant dense<0.000000e+00> : vector<16xf32>
    %63 = vector.multi_reduction <add>, %62, %cst_35 [1] : vector<16x224xf32> to vector<16xf32>
    %64 = vector.shape_cast %63 : vector<16xf32> to vector<16x1xf32>
    %65 = arith.mulf %59, %59 : vector<16x1xf32>
    %cst_36 = arith.constant 6.400000e+01 : f32
    %66 = vector.broadcast %cst_36 : f32 to vector<16x1xf32>
    %67 = arith.mulf %66, %65 : vector<16x1xf32>
    %68 = arith.addf %64, %67 : vector<16x1xf32>
    %cst_37 = arith.constant 0.00347222225 : f32
    %69 = vector.broadcast %cst_37 : f32 to vector<16x1xf32>
    %70 = arith.mulf %68, %69 : vector<16x1xf32>
    %cst_38 = arith.constant 9.99999974E-6 : f32
    %71 = vector.broadcast %cst_38 : f32 to vector<16x1xf32>
    %72 = arith.addf %70, %71 : vector<16x1xf32>
    %73 = math.rsqrt %72 : vector<16x1xf32>
    %c0_39 = arith.constant 0 : index
    %c0_40 = arith.constant 0 : index
    %74 = vector.load %arg8[%c0_39, %c0_40] : memref<16x1xf32, #tpu.memory_space<vmem>>, vector<16x1xf32>
    %75 = arith.mulf %73, %74 : vector<16x1xf32>
    %76 = vector.broadcast %75 : vector<16x1xf32> to vector<16x224xf32>
    %77 = arith.mulf %61, %76 : vector<16x224xf32>
    %c0_41 = arith.constant 0 : index
    %c0_42 = arith.constant 0 : index
    %78 = vector.load %arg9[%c0_41, %c0_42] : memref<16x1xf32, #tpu.memory_space<vmem>>, vector<16x1xf32>
    %79 = vector.broadcast %78 : vector<16x1xf32> to vector<16x224xf32>
    %80 = arith.addf %77, %79 : vector<16x224xf32>
    %c0_43 = arith.constant 0 : index
    %c0_44 = arith.constant 0 : index
    %81 = vector.load %arg9[%c0_43, %c0_44] : memref<16x1xf32, #tpu.memory_space<vmem>>, vector<16x1xf32>
    %82 = arith.mulf %59, %75 : vector<16x1xf32>
    %83 = arith.subf %81, %82 : vector<16x1xf32>
    %84 = vector.extract_strided_slice %80 {offsets = [0, 0], sizes = [2, 224], strides = [1, 1]} : vector<16x224xf32> to vector<2x224xf32>
    %cst_45 = arith.constant dense<0xFF800000> : vector<224xf32>
    %85 = vector.multi_reduction <maximumf>, %84, %cst_45 [0] : vector<2x224xf32> to vector<224xf32>
    %86 = vector.shape_cast %85 : vector<224xf32> to vector<1x224xf32>
    %87 = vector.extract_strided_slice %83 {offsets = [0, 0], sizes = [2, 1], strides = [1, 1]} : vector<16x1xf32> to vector<2x1xf32>
    %cst_46 = arith.constant dense<0xFF800000> : vector<1xf32>
    %88 = vector.multi_reduction <maximumf>, %87, %cst_46 [0] : vector<2x1xf32> to vector<1xf32>
    %89 = vector.shape_cast %88 : vector<1xf32> to vector<1x1xf32>
    %90 = vector.extract_strided_slice %80 {offsets = [2, 0], sizes = [2, 224], strides = [1, 1]} : vector<16x224xf32> to vector<2x224xf32>
    %cst_47 = arith.constant dense<0xFF800000> : vector<224xf32>
    %91 = vector.multi_reduction <maximumf>, %90, %cst_47 [0] : vector<2x224xf32> to vector<224xf32>
    %92 = vector.shape_cast %91 : vector<224xf32> to vector<1x224xf32>
    %93 = vector.extract_strided_slice %83 {offsets = [2, 0], sizes = [2, 1], strides = [1, 1]} : vector<16x1xf32> to vector<2x1xf32>
    %cst_48 = arith.constant dense<0xFF800000> : vector<1xf32>
    %94 = vector.multi_reduction <maximumf>, %93, %cst_48 [0] : vector<2x1xf32> to vector<1xf32>
    %95 = vector.shape_cast %94 : vector<1xf32> to vector<1x1xf32>
    %96 = vector.extract_strided_slice %80 {offsets = [4, 0], sizes = [2, 224], strides = [1, 1]} : vector<16x224xf32> to vector<2x224xf32>
    %cst_49 = arith.constant dense<0xFF800000> : vector<224xf32>
    %97 = vector.multi_reduction <maximumf>, %96, %cst_49 [0] : vector<2x224xf32> to vector<224xf32>
    %98 = vector.shape_cast %97 : vector<224xf32> to vector<1x224xf32>
    %99 = vector.extract_strided_slice %83 {offsets = [4, 0], sizes = [2, 1], strides = [1, 1]} : vector<16x1xf32> to vector<2x1xf32>
    %cst_50 = arith.constant dense<0xFF800000> : vector<1xf32>
    %100 = vector.multi_reduction <maximumf>, %99, %cst_50 [0] : vector<2x1xf32> to vector<1xf32>
    %101 = vector.shape_cast %100 : vector<1xf32> to vector<1x1xf32>
    %102 = vector.extract_strided_slice %80 {offsets = [6, 0], sizes = [2, 224], strides = [1, 1]} : vector<16x224xf32> to vector<2x224xf32>
    %cst_51 = arith.constant dense<0xFF800000> : vector<224xf32>
    %103 = vector.multi_reduction <maximumf>, %102, %cst_51 [0] : vector<2x224xf32> to vector<224xf32>
    %104 = vector.shape_cast %103 : vector<224xf32> to vector<1x224xf32>
    %105 = vector.extract_strided_slice %83 {offsets = [6, 0], sizes = [2, 1], strides = [1, 1]} : vector<16x1xf32> to vector<2x1xf32>
    %cst_52 = arith.constant dense<0xFF800000> : vector<1xf32>
    %106 = vector.multi_reduction <maximumf>, %105, %cst_52 [0] : vector<2x1xf32> to vector<1xf32>
    %107 = vector.shape_cast %106 : vector<1xf32> to vector<1x1xf32>
    %108 = vector.extract_strided_slice %80 {offsets = [8, 0], sizes = [2, 224], strides = [1, 1]} : vector<16x224xf32> to vector<2x224xf32>
    %cst_53 = arith.constant dense<0xFF800000> : vector<224xf32>
    %109 = vector.multi_reduction <maximumf>, %108, %cst_53 [0] : vector<2x224xf32> to vector<224xf32>
    %110 = vector.shape_cast %109 : vector<224xf32> to vector<1x224xf32>
    %111 = vector.extract_strided_slice %83 {offsets = [8, 0], sizes = [2, 1], strides = [1, 1]} : vector<16x1xf32> to vector<2x1xf32>
    %cst_54 = arith.constant dense<0xFF800000> : vector<1xf32>
    %112 = vector.multi_reduction <maximumf>, %111, %cst_54 [0] : vector<2x1xf32> to vector<1xf32>
    %113 = vector.shape_cast %112 : vector<1xf32> to vector<1x1xf32>
    %114 = vector.extract_strided_slice %80 {offsets = [10, 0], sizes = [2, 224], strides = [1, 1]} : vector<16x224xf32> to vector<2x224xf32>
    %cst_55 = arith.constant dense<0xFF800000> : vector<224xf32>
    %115 = vector.multi_reduction <maximumf>, %114, %cst_55 [0] : vector<2x224xf32> to vector<224xf32>
    %116 = vector.shape_cast %115 : vector<224xf32> to vector<1x224xf32>
    %117 = vector.extract_strided_slice %83 {offsets = [10, 0], sizes = [2, 1], strides = [1, 1]} : vector<16x1xf32> to vector<2x1xf32>
    %cst_56 = arith.constant dense<0xFF800000> : vector<1xf32>
    %118 = vector.multi_reduction <maximumf>, %117, %cst_56 [0] : vector<2x1xf32> to vector<1xf32>
    %119 = vector.shape_cast %118 : vector<1xf32> to vector<1x1xf32>
    %120 = vector.extract_strided_slice %80 {offsets = [12, 0], sizes = [2, 224], strides = [1, 1]} : vector<16x224xf32> to vector<2x224xf32>
    %cst_57 = arith.constant dense<0xFF800000> : vector<224xf32>
    %121 = vector.multi_reduction <maximumf>, %120, %cst_57 [0] : vector<2x224xf32> to vector<224xf32>
    %122 = vector.shape_cast %121 : vector<224xf32> to vector<1x224xf32>
    %123 = vector.extract_strided_slice %83 {offsets = [12, 0], sizes = [2, 1], strides = [1, 1]} : vector<16x1xf32> to vector<2x1xf32>
    %cst_58 = arith.constant dense<0xFF800000> : vector<1xf32>
    %124 = vector.multi_reduction <maximumf>, %123, %cst_58 [0] : vector<2x1xf32> to vector<1xf32>
    %125 = vector.shape_cast %124 : vector<1xf32> to vector<1x1xf32>
    %126 = vector.extract_strided_slice %80 {offsets = [14, 0], sizes = [2, 224], strides = [1, 1]} : vector<16x224xf32> to vector<2x224xf32>
    %cst_59 = arith.constant dense<0xFF800000> : vector<224xf32>
    %127 = vector.multi_reduction <maximumf>, %126, %cst_59 [0] : vector<2x224xf32> to vector<224xf32>
    %128 = vector.shape_cast %127 : vector<224xf32> to vector<1x224xf32>
    %129 = vector.extract_strided_slice %83 {offsets = [14, 0], sizes = [2, 1], strides = [1, 1]} : vector<16x1xf32> to vector<2x1xf32>
    %cst_60 = arith.constant dense<0xFF800000> : vector<1xf32>
    %130 = vector.multi_reduction <maximumf>, %129, %cst_60 [0] : vector<2x1xf32> to vector<1xf32>
    %131 = vector.shape_cast %130 : vector<1xf32> to vector<1x1xf32>
    %132 = tpu.concatenate %86, %92, %98, %104, %110, %116, %122, %128 in 0 : vector<1x224xf32>, vector<1x224xf32>, vector<1x224xf32>, vector<1x224xf32>, vector<1x224xf32>, vector<1x224xf32>, vector<1x224xf32>, vector<1x224xf32> -> vector<8x224xf32>
    %133 = tpu.concatenate %89, %95, %101, %107, %113, %119, %125, %131 in 0 : vector<1x1xf32>, vector<1x1xf32>, vector<1x1xf32>, vector<1x1xf32>, vector<1x1xf32>, vector<1x1xf32>, vector<1x1xf32>, vector<1x1xf32> -> vector<8x1xf32>
    %134 = vector.extract_strided_slice %132 {offsets = [0, 0], sizes = [8, 16], strides = [1, 1]} : vector<8x224xf32> to vector<8x16xf32>
    %135 = vector.broadcast %133 : vector<8x1xf32> to vector<8x16xf32>
    %136 = arith.maximumf %134, %135 : vector<8x16xf32>
    %137 = vector.extract_strided_slice %132 {offsets = [0, 0], sizes = [8, 16], strides = [1, 1]} : vector<8x224xf32> to vector<8x16xf32>
    %138 = vector.extract_strided_slice %132 {offsets = [0, 16], sizes = [8, 16], strides = [1, 1]} : vector<8x224xf32> to vector<8x16xf32>
    %139 = arith.maximumf %137, %138 : vector<8x16xf32>
    %140 = vector.extract_strided_slice %132 {offsets = [0, 32], sizes = [8, 16], strides = [1, 1]} : vector<8x224xf32> to vector<8x16xf32>
    %141 = arith.maximumf %139, %140 : vector<8x16xf32>
    %142 = vector.extract_strided_slice %132 {offsets = [0, 32], sizes = [8, 16], strides = [1, 1]} : vector<8x224xf32> to vector<8x16xf32>
    %143 = vector.extract_strided_slice %132 {offsets = [0, 48], sizes = [8, 16], strides = [1, 1]} : vector<8x224xf32> to vector<8x16xf32>
    %144 = arith.maximumf %142, %143 : vector<8x16xf32>
    %145 = vector.extract_strided_slice %132 {offsets = [0, 64], sizes = [8, 16], strides = [1, 1]} : vector<8x224xf32> to vector<8x16xf32>
    %146 = arith.maximumf %144, %145 : vector<8x16xf32>
    %147 = vector.extract_strided_slice %132 {offsets = [0, 64], sizes = [8, 16], strides = [1, 1]} : vector<8x224xf32> to vector<8x16xf32>
    %148 = vector.extract_strided_slice %132 {offsets = [0, 80], sizes = [8, 16], strides = [1, 1]} : vector<8x224xf32> to vector<8x16xf32>
    %149 = arith.maximumf %147, %148 : vector<8x16xf32>
    %150 = vector.extract_strided_slice %132 {offsets = [0, 96], sizes = [8, 16], strides = [1, 1]} : vector<8x224xf32> to vector<8x16xf32>
    %151 = arith.maximumf %149, %150 : vector<8x16xf32>
    %152 = vector.extract_strided_slice %132 {offsets = [0, 112], sizes = [8, 16], strides = [1, 1]} : vector<8x224xf32> to vector<8x16xf32>
    %153 = vector.extract_strided_slice %132 {offsets = [0, 128], sizes = [8, 16], strides = [1, 1]} : vector<8x224xf32> to vector<8x16xf32>
    %154 = arith.maximumf %152, %153 : vector<8x16xf32>
    %155 = vector.extract_strided_slice %132 {offsets = [0, 144], sizes = [8, 16], strides = [1, 1]} : vector<8x224xf32> to vector<8x16xf32>
    %156 = arith.maximumf %154, %155 : vector<8x16xf32>
    %157 = vector.extract_strided_slice %132 {offsets = [0, 144], sizes = [8, 16], strides = [1, 1]} : vector<8x224xf32> to vector<8x16xf32>
    %158 = vector.extract_strided_slice %132 {offsets = [0, 160], sizes = [8, 16], strides = [1, 1]} : vector<8x224xf32> to vector<8x16xf32>
    %159 = arith.maximumf %157, %158 : vector<8x16xf32>
    %160 = vector.extract_strided_slice %132 {offsets = [0, 176], sizes = [8, 16], strides = [1, 1]} : vector<8x224xf32> to vector<8x16xf32>
    %161 = arith.maximumf %159, %160 : vector<8x16xf32>
    %162 = vector.extract_strided_slice %132 {offsets = [0, 176], sizes = [8, 16], strides = [1, 1]} : vector<8x224xf32> to vector<8x16xf32>
    %163 = vector.extract_strided_slice %132 {offsets = [0, 192], sizes = [8, 16], strides = [1, 1]} : vector<8x224xf32> to vector<8x16xf32>
    %164 = arith.maximumf %162, %163 : vector<8x16xf32>
    %165 = vector.extract_strided_slice %132 {offsets = [0, 208], sizes = [8, 16], strides = [1, 1]} : vector<8x224xf32> to vector<8x16xf32>
    %166 = arith.maximumf %164, %165 : vector<8x16xf32>
    %167 = vector.extract_strided_slice %132 {offsets = [0, 208], sizes = [8, 16], strides = [1, 1]} : vector<8x224xf32> to vector<8x16xf32>
    %168 = vector.broadcast %133 : vector<8x1xf32> to vector<8x16xf32>
    %169 = arith.maximumf %167, %168 : vector<8x16xf32>
    %170 = tpu.concatenate %136, %141, %146, %151, %156, %161, %166, %169 in 0 : vector<8x16xf32>, vector<8x16xf32>, vector<8x16xf32>, vector<8x16xf32>, vector<8x16xf32>, vector<8x16xf32>, vector<8x16xf32>, vector<8x16xf32> -> vector<64x16xf32>
    %c0_61 = arith.constant 0 : index
    %c0_62 = arith.constant 0 : index
    %171 = vector.load %arg10[%c0_61, %c0_62] : memref<4x64xf32, #tpu.memory_space<vmem>>, vector<4x64xf32>
    %cst_63 = arith.constant dense<0.000000e+00> : vector<4x16xf32>
    %172 = tpu.matmul %171, %170, %cst_63 {dimension_numbers = #tpu.dot_dimension_numbers<[1], [0], [0], [1], [0, 0, 1, 1], [], []>} : vector<4x64xf32>, vector<64x16xf32>, vector<4x16xf32> -> vector<4x16xf32>
    %173 = vector.extract_strided_slice %172 {offsets = [0, 0], sizes = [2, 16], strides = [1, 1]} : vector<4x16xf32> to vector<2x16xf32>
    %c0_64 = arith.constant 0 : index
    %c0_65 = arith.constant 0 : index
    %174 = vector.load %arg12[%c0_64, %c0_65] : memref<16x128xf32, #tpu.memory_space<vmem>>, vector<16x128xf32>
    %cst_66 = arith.constant dense<0.000000e+00> : vector<2x128xf32>
    %175 = tpu.matmul %173, %174, %cst_66 {dimension_numbers = #tpu.dot_dimension_numbers<[1], [0], [0], [1], [0, 0, 1, 1], [], []>} : vector<2x16xf32>, vector<16x128xf32>, vector<2x128xf32> -> vector<2x128xf32>
    %176 = vector.extract_strided_slice %172 {offsets = [2, 0], sizes = [2, 16], strides = [1, 1]} : vector<4x16xf32> to vector<2x16xf32>
    %c0_67 = arith.constant 0 : index
    %c0_68 = arith.constant 0 : index
    %177 = vector.load %arg13[%c0_67, %c0_68] : memref<16x128xf32, #tpu.memory_space<vmem>>, vector<16x128xf32>
    %cst_69 = arith.constant dense<0.000000e+00> : vector<2x128xf32>
    %178 = tpu.matmul %176, %177, %cst_69 {dimension_numbers = #tpu.dot_dimension_numbers<[1], [0], [0], [1], [0, 0, 1, 1], [], []>} : vector<2x16xf32>, vector<16x128xf32>, vector<2x128xf32> -> vector<2x128xf32>
    %179 = arith.addf %175, %178 : vector<2x128xf32>
    %c0_70 = arith.constant 0 : index
    %c0_71 = arith.constant 0 : index
    %180 = vector.load %arg11[%c0_70, %c0_71] : memref<2x1xf32, #tpu.memory_space<vmem>>, vector<2x1xf32>
    %181 = vector.broadcast %180 : vector<2x1xf32> to vector<2x128xf32>
    %182 = arith.addf %179, %181 : vector<2x128xf32>
    %cst_72 = arith.constant 0.000000e+00 : f32
    %183 = vector.broadcast %cst_72 : f32 to vector<2x128xf32>
    %184 = arith.maximumf %182, %183 : vector<2x128xf32>
    %c0_73 = arith.constant 0 : index
    %c0_74 = arith.constant 0 : index
    %185 = vector.load %arg14[%c0_73, %c0_74] : memref<2x128xf32, #tpu.memory_space<vmem>>, vector<2x128xf32>
    %cst_75 = arith.constant 1.000000e+07 : f32
    %186 = vector.broadcast %cst_75 : f32 to vector<2x128xf32>
    %187 = arith.mulf %185, %186 : vector<2x128xf32>
    %188 = arith.addf %184, %187 : vector<2x128xf32>
    %c0_76 = arith.constant 0 : index
    %c0_77 = arith.constant 0 : index
    %189 = vector.load %arg15[%c0_76, %c0_77] : memref<2x128xf32, #tpu.memory_space<vmem>>, vector<2x128xf32>
    tpu.vector_store %arg15[%c0_76, %c0_77], %188 {strides = array<i32>} : memref<2x128xf32, #tpu.memory_space<vmem>>, vector<2x128xf32>,
    return
  }
}

</mosaic_0001>

<bundles_post_ra>
// kernel: tpu_custom_call.1
= control target key start
LH: loop header
LB: loop body
LE: loop exit
PB: predicated region body
PF: predicated region fallthrough
CT: control target
= control target key end

     0   :  { %vm75_vm0 = vcmask 130048   ;;  %v1002_v6 = vmov 0   ;;  %s1341_s0 = inlined_call_operand.vmem [shape: f32[16,272], index: 0, kind: input, shape index: {}]   ;;  %s1342_s1 = inlined_call_operand.vmem [shape: f32[1,272], index: 1, kind: input, shape index: {}]   ;;  %s1343_s2 = inlined_call_operand.vmem [shape: f32[8,16], index: 2, kind: input, shape index: {}]   ;;  %s1344_s3 = inlined_call_operand.vmem [shape: f32[8,1], index: 3, kind: input, shape index: {}]   ;;  %s1345_s4 = inlined_call_operand.vmem [shape: f32[8,1], index: 4, kind: input, shape index: {}]   ;;  %s1346_s5 = inlined_call_operand.vmem [shape: f32[8,1], index: 5, kind: input, shape index: {}]   ;;  %s1347_s6 = inlined_call_operand.vmem [shape: f32[4,16,8], index: 6, kind: input, shape index: {}]   ;;  %s1348_s7 = inlined_call_operand.vmem [shape: f32[16,1], index: 7, kind: input, shape index: {}]   ;;  %s1349_s8 = inlined_call_operand.vmem [shape: f32[16,1], index: 8, kind: input, shape index: {}]   ;;  %s1350_s9 = inlined_call_operand.vmem [shape: f32[16,1], index: 9, kind: input, shape index: {}]   ;;  %s1351_s10 = inlined_call_operand.vmem [shape: f32[4,64], index: 10, kind: input, shape index: {}]   ;;  %s1352_s11 = inlined_call_operand.vmem [shape: f32[2,1], index: 11, kind: input, shape index: {}]   ;;  %s1353_s12 = inlined_call_operand.vmem [shape: f32[16,128], index: 12, kind: input, shape index: {}]   ;;  %s1354_s13 = inlined_call_operand.vmem [shape: f32[16,128], index: 13, kind: input, shape index: {}]   ;;  %s1355_s14 = inlined_call_operand.vmem [shape: f32[2,128], index: 14, kind: input, shape index: {}]   ;;  %s1356_s15 = inlined_call_operand.hbm [shape: f32[2,128], index: 15, kind: output, shape index: {}]  }
   0x1   :  { %v57_v0 = vld [vmem:[%s1341_s0 + $0x28] sm:$0xff]  ;;  %v54_v1 = vld [vmem:[%s1341_s0 + $0x10] sm:$0xff]  ;;  %v51_v2 = vld [vmem:[%s1343_s2] sm:$0xff]  ;;  %957 = vset.pattern.permute.xlu0 %v1002_v6 }
   0x2   :  { %133 = vmatpush.msra.mxu2 %v57_v0  ;;  %v55_v3 = vld [vmem:[%s1341_s0 + $0x18] sm:$0xff]  ;;  %v56_v4 = vld [vmem:[%s1341_s0 + $0x20] sm:$0xff]  ;;  %v53_v7 = vld [vmem:[%s1341_s0 + $0x8] sm:$0xff] }
   0x3   :  { %v52_v5 = vld [vmem:[%s1341_s0] sm:$0xff]  ;;  %93 = vmatpush.msra.mxu0 %v55_v3  ;;  %113 = vmatpush.msra.mxu1 %v56_v4 }
   0x4   :  { %v58_v8 = vld [vmem:[%s1344_s3] sm:$0xff] }
   0x5   :  { %20 = vsyncpa [#allocation3], 0  ;;  %134 = vmatpush.msra.mxu2 %v54_v1  ;;  %62 = vperm.xlu0 %957, %v58_v8   ;;  %v59_v9 = vld [vmem:[%s1342_s1] sm:$0x7]  ;;  %vm204_vm4 = vcmask 64512   ;;  %s1003_s22 = smov 112  }
   0x6   :  { %923 = vmatmul.msk.f32.vlgmr.msra.gmra.mxu2 %vm75_vm0, %v51_v2  ;;  %94 = vmatpush.msra.mxu0 %v52_v5  ;;  %v66_v10 = vperm.slane %v59_v9, 0  ;;  %v67_v12 = vperm.slane %v59_v9, 1  ;;  %v68_v15 = vperm.slane %v59_v9, 2  ;;  %v181_v40 = vld [vmem:[%s1346_s5] sm:$0xff]  ;;  %v193_v60 = vld [vmem:[%s1348_s7 + $0x8] sm:$0xff]  ;;  %s1005_s27 = smov 96  }
   0x7   :  { %114 = vmatpush.msra.mxu1 %v53_v7  ;;  %921 = vmatmul.msk.f32.vlgmr.msra.gmra.mxu0 %vm75_vm0, %v51_v2  ;;  %v171_v50 = vld [vmem:[%s1345_s4] sm:$0xff]  ;;  %s1004_s4 = smov 80   ;;  %v191_v61 = vld [vmem:[%s1347_s6 + $0x8] sm:$0xff]  ;;  %v928_v3 = vld [vmem:[%s1347_s6 + $0x10] sm:$0xff]  ;;  %vm266_vm5 = vcmask 916480   ;;  %vm333_vm6 = vcmask 785408  }
   0x8   :  { %922 = vmatmul.msk.f32.vlgmr.msra.gmra.mxu1 %vm75_vm0, %v51_v2  ;;  %958 = vset.pattern.permute.xlu1 %v1002_v6  ;;  %v190_v59 = vld [vmem:[%s1347_s6] sm:$0xff]  ;;  %v929_v5 = vld [vmem:[%s1347_s6 + $0x18] sm:$0xff]  ;;  %vm403_vm7 = vcmask 654336   ;;  %vm578_vm11 = vcmask 1024   ;;  %vm602_vm12 = vcmask 3074   ;;  %vm626_vm13 = vcmask 5124  }
   0x9   :  { %959 = vset.pattern.permute.xlu2 %v1002_v6  ;;  %v192_v2 = vld [vmem:[%s1348_s7] sm:$0xff]  ;;  %vm650_vm14 = vcmask 7174   ;;  %s1007_s29 = smov 16   ;;  %s1008_s16 = smov 64  }
   0xa   :  { %184 = vperm.xlu2 %959, %v181_v40   ;;  %s1009_s3 = smov [#allocation2]  }
  0x64   :  { %v185_v54 = vpop.permute.xlu2 %184 }
  0x77   :  { %v63_v11 = vpop.permute.xlu0 %62 }
  0x78   :  { %v72_v13 = vmul.f32 %v66_v10, %v63_v11  ;;  %v73_v14 = vmul.f32 %v67_v12, %v63_v11  ;;  %v74_v20 = vmul.f32 %v68_v15, %v63_v11  ;;  %v934_v11 = vld [vmem:[%s1347_s6 + $0x20] sm:$0xff] }
  0x84   :  { %v96_v16 = vpop.f32.mrf.mxu0 }
  0x85   :  { %v97_v17 = vadd.f32 %v96_v16, %v72_v13  ;;  %v116_v18 = vpop.f32.mrf.mxu1  ;;  %v935_v16 = vld [vmem:[%s1347_s6 + $0x28] sm:$0xff] }
  0x86   :  { %v117_v19 = vadd.f32 %v116_v18, %v73_v14 }
  0x87   :  { %v139_v21 = vmax.f32 %v97_v17, 0.0 }
  0x88   :  { %v140_v22 = vmax.f32 %v117_v19, 0.0 }
  0x89   :  { %v136_v23 = vpop.f32.mrf.mxu2 }
  0x8a   :  { %v137_v24 = vadd.f32 %v136_v23, %v74_v20  ;;  %v142_v25 = vadd.f32 %v140_v22, %v139_v21  ;;  %v940_v20 = vld [vmem:[%s1347_s6 + $0x30] sm:$0xff] }
  0x8c   :  { %v141_v26 = vmax.f32 %v137_v24, 0.0 }
  0x8e   :  { %v143_v27 = vsel %vm75_vm0, %v141_v26, 0.0 }
  0x8f   :  { %v144_v28 = vadd.f32 %v143_v27, %v142_v25 }
  0x91   :  { %145 = vadd.xlane.f32.xlu0 %v144_v28 }
 0x104   :  { %v146_v29 = vpop.xlane.xlu0 %145 }
 0x105   :  { %v147_v30 = vmul.f32 0.0036764706, %v146_v29 }
 0x107   :  { %v148_v31 = vsub.f32 %v139_v21, %v147_v30  ;;  %v149_v32 = vsub.f32 %v140_v22, %v147_v30  ;;  %v150_v33 = vsub.f32 %v141_v26, %v147_v30  ;;  %v941_v21 = vld [vmem:[%s1347_s6 + $0x38] sm:$0xff]  ;;  %s912_s6 = sshll.u32 %s1356_s15, 4  ;;  %s913_s6 = int_to_ptr.hbm [resolvable:$true] %s912_s6 }
 0x109   :  { %v151_v34 = vmul.f32 %v148_v31, %v148_v31  ;;  %v152_v35 = vmul.f32 %v149_v32, %v149_v32  ;;  %v153_v36 = vmul.f32 %v150_v33, %v150_v33 }
 0x10b   :  { %v154_v37 = vadd.f32 %v152_v35, %v151_v34  ;;  %v155_v38 = vsel %vm75_vm0, %v153_v36, 0.0 }
 0x10d   :  { %v156_v39 = vadd.f32 %v155_v38, %v154_v37 }
 0x10f   :  { %157 = vadd.xlane.f32.xlu1 %v156_v39 }
 0x182   :  { %v158_v41 = vpop.xlane.xlu1 %157 }
 0x183   :  { %v159_v42 = vmul.f32 0.0036764706, %v158_v41 }
 0x185   :  { %v160_v43 = vadd.f32 1e-05, %v159_v42 }
 0x187   :  { %970 = vrsqrt.f32 %v160_v43  ;;  %vm167_vm2 = vweird.f32 %v160_v43 }
 0x18d   :  { %v971_v44 = vpop.eup %970 }
 0x18e   :  { %v162_v45 = vmul.f32 %v971_v44, %v160_v43  ;;  %vm168_vm1 = vweird.f32 %v971_v44 }
 0x18f   :  { %vm169_vm3 = vmor %vm167_vm2, %vm168_vm1 }
 0x190   :  { %v163_v46 = vmul.f32 %v971_v44, %v162_v45 }
 0x192   :  { %v164_v47 = vmul.f32 0.5, %v163_v46 }
 0x194   :  { %v165_v48 = vsub.f32 1.5, %v164_v47 }
 0x196   :  { %v166_v49 = vmul.f32 %v971_v44, %v165_v48 }
 0x198   :  { %v170_v51 = vsel %vm169_vm3, %v971_v44, %v166_v49  ;;  %vm742_vm3 = vcmask 1040384  }
 0x199   :  { %v172_v52 = vmul.f32 %v171_v50, %v170_v51 }
 0x19b   :  { %175 = vperm.xlu1 %958, %v172_v52  }
 0x20d   :  { %v176_v53 = vpop.permute.xlu1 %175 }
 0x20e   :  { %v178_v55 = vmul.f32 %v176_v53, %v148_v31  ;;  %v179_v56 = vmul.f32 %v176_v53, %v149_v32  ;;  %v180_v62 = vmul.f32 %v176_v53, %v150_v33 }
 0x210   :  { %v187_v57 = vadd.f32 %v185_v54, %v178_v55  ;;  %v188_v58 = vadd.f32 %v185_v54, %v179_v56  ;;  %v189_v0 = vadd.f32 %v185_v54, %v180_v62 }
 0x212   :  { %264 = vrot.lane.b32.xlu2 %v188_v58, %s1003_s22  ;;  %249 = vmatpush.msrb.mxu0 %v188_v58  ;;  %v960_v63 = vpack.i.bf16 %v188_v58, %v187_v57  ;;  %v965_v1 = vpack.i.bf16 %v189_v0, %v188_v58  ;;  %v1185_v0 = vld [vmem:[%s1350_s9 + $0x8] sm:$0xff] }
 0x213   :  { %397 = vrot.lane.b32.xlu1 %v187_v57, %s1004_s4  ;;  %226 = vmatpush.msra.mxu3 %v187_v57 }
 0x214   :  { %924 = vmatmul.msk.f32.vlgmr.msra.gmra.mxu3 %vm204_vm4, %v190_v59  ;;  %926 = vmatmul.msk.f32.vlgmr.msrb.gmra.mxu0 %vm204_vm4, %v190_v59 }
 0x21a   :  { %262 = vrot.lane.b32.xlu2 %v187_v57, %s1003_s22 }
 0x21b   :  { %201 = vperm.xlu1 %958, %v193_v60  }
 0x21c   :  { %925 = vmatmul.msk.f32.gmra.mxu3 %vm204_vm4, %v191_v61  ;;  %927 = vmatmul.msk.f32.gmra.mxu0 %vm204_vm4, %v191_v61 }
 0x222   :  { %961 = vrot.lane.b32.xlu2 %v960_v63, %s1005_s27 }
 0x22a   :  { %966 = vrot.lane.b32.xlu2 %v965_v1, %s1004_s4 }
 0x232   :  { %196 = vperm.xlu2 %959, %v192_v2  }
 0x26c   :  { %v265_v4 = vpop.permute.xlu2 %264 }
 0x26d   :  { %314 = vmatpush.msrb.mxu2 %v265_v4 }
 0x26e   :  { %932 = vmatmul.msk.f32.vlgmr.msrb.gmra.mxu2 %vm204_vm4, %v928_v3 }
 0x274   :  { %v263_v6 = vpop.permute.xlu2 %262 }
 0x275   :  { %v267_v7 = vsel %vm266_vm5, %v263_v6, %v265_v4  ;;  %vm747_vm5 = vcmask 1042432  }
 0x276   :  { %291 = vmatpush.msrb.mxu1 %v267_v7  ;;  %933 = vmatmul.msk.f32.gmra.mxu2 %vm204_vm4, %v929_v5 }
 0x277   :  { %930 = vmatmul.msk.f32.vlgmr.msrb.gmra.mxu1 %vm204_vm4, %v928_v3 }
 0x27c   :  { %v962_v8 = vpop.permute.xlu2 %961 }
 0x27d   :  { %v964_v9 = vunpack.i.h.bf16 %v962_v8  ;;  %v963_v10 = vunpack.i.l.bf16 %v962_v8 }
 0x27f   :  { %931 = vmatmul.msk.f32.gmra.mxu1 %vm204_vm4, %v929_v5  ;;  %381 = vmatpush.msra.mxu0 %v964_v9  ;;  %v334_v12 = vsel %vm333_vm6, %v963_v10, %v964_v9 }
 0x280   :  { %358 = vmatpush.msrb.mxu3 %v334_v12  ;;  %938 = vmatmul.msk.f32.vlgmr.msra.gmra.mxu0 %vm204_vm4, %v934_v11 }
 0x281   :  { %936 = vmatmul.msk.f32.vlgmr.msrb.gmra.mxu3 %vm204_vm4, %v934_v11 }
 0x284   :  { %v967_v13 = vpop.permute.xlu2 %966 }
 0x285   :  { %v969_v14 = vunpack.i.h.bf16 %v967_v13  ;;  %v968_v15 = vunpack.i.l.bf16 %v967_v13  ;;  %v398_v17 = vpop.permute.xlu1 %397 }
 0x287   :  { %v404_v18 = vsel %vm403_vm7, %v398_v17, %v968_v15  ;;  %v405_v19 = vsel %vm403_vm7, %v968_v15, %v969_v14  ;;  %vm753_vm7 = vcmask 1044480  }
 0x288   :  { %939 = vmatmul.msk.f32.gmra.mxu0 %vm204_vm4, %v935_v16  ;;  %429 = vmatpush.msra.mxu1 %v404_v18 }
 0x289   :  { %452 = vmatpush.msra.mxu2 %v405_v19  ;;  %937 = vmatmul.msk.f32.gmra.mxu3 %vm204_vm4, %v935_v16 }
 0x28a   :  { %942 = vmatmul.msk.f32.vlgmr.msra.gmra.mxu1 %vm204_vm4, %v940_v20  ;;  %944 = vmatmul.msk.f32.vlgmr.msra.gmra.mxu2 %vm204_vm4, %v940_v20 }
 0x28c   :  { %v197_v29 = vpop.permute.xlu2 %196 }
 0x28d   :  { %v202_v39 = vpop.permute.xlu1 %201 }
 0x291   :  { %v251_v23 = vpop.f32.mrf.mxu0 }
 0x292   :  { %943 = vmatmul.msk.f32.gmra.mxu1 %vm204_vm4, %v941_v21  ;;  %945 = vmatmul.msk.f32.gmra.mxu2 %vm204_vm4, %v941_v21  ;;  %v252_v35 = vadd.f32 %v251_v23, %v197_v29  ;;  %vm562_vm4 = vcmask 1041408  }
 0x297   :  { %v228_v22 = vpop.f32.mrf.mxu3 }
 0x298   :  { %v229_v31 = vadd.f32 %v228_v22, %v197_v29 }
 0x299   :  { %v254_v27 = vpop.f32.mrf.mxu0 }
 0x29a   :  { %v255_v47 = vadd.f32 %v254_v27, %v202_v39 }
 0x29f   :  { %v231_v26 = vpop.f32.mrf.mxu3 }
 0x2a0   :  { %v232_v41 = vadd.f32 %v231_v26, %v202_v39 }
 0x2f1   :  { %v316_v25 = vpop.f32.mrf.mxu2 }
 0x2f2   :  { %v323_v38 = vadd.f32 %v316_v25, %v252_v35 }
 0x2f4   :  { %v293_v24 = vpop.f32.mrf.mxu1 }
 0x2f5   :  { %v322_v33 = vadd.f32 %v293_v24, %v229_v31 }
 0x2f9   :  { %v319_v32 = vpop.f32.mrf.mxu2 }
 0x2fa   :  { %v325_v52 = vadd.f32 %v319_v32, %v255_v47 }
 0x2fc   :  { %v296_v28 = vpop.f32.mrf.mxu1 }
 0x2fd   :  { %v383_v34 = vpop.f32.mrf.mxu0  ;;  %v324_v46 = vadd.f32 %v296_v28, %v232_v41 }
 0x2fe   :  { %v390_v40 = vadd.f32 %v383_v34, %v323_v38 }
 0x304   :  { %v360_v30 = vpop.f32.mrf.mxu3 }
 0x305   :  { %v389_v37 = vadd.f32 %v360_v30, %v322_v33  ;;  %v386_v49 = vpop.f32.mrf.mxu0 }
 0x306   :  { %v392_v56 = vadd.f32 %v386_v49, %v325_v52 }
 0x307   :  { %v431_v36 = vpop.f32.mrf.mxu1 }
 0x308   :  { %v460_v42 = vadd.f32 %v431_v36, %v389_v37  ;;  %v524_v37 = vld [vmem:[%s1349_s8] sm:$0xff] }
 0x30a   :  { %v464_v50 = vmax.f32 %v460_v42, 0.0  ;;  %v542_v42 = vld [vmem:[%s1350_s9] sm:$0xff] }
 0x30c   :  { %v363_v44 = vpop.f32.mrf.mxu3 }
 0x30d   :  { %v454_v43 = vpop.f32.mrf.mxu2  ;;  %v391_v51 = vadd.f32 %v363_v44, %v324_v46 }
 0x30e   :  { %v461_v45 = vadd.f32 %v454_v43, %v390_v40 }
 0x30f   :  { %v434_v53 = vpop.f32.mrf.mxu1 }
 0x310   :  { %v465_v48 = vmax.f32 %v461_v45, 0.0  ;;  %v462_v57 = vadd.f32 %v434_v53, %v391_v51 }
 0x312   :  { %v468_v54 = vsel %vm333_vm6, %v465_v48, 0.0  ;;  %v466_v61 = vmax.f32 %v462_v57, 0.0 }
 0x313   :  { %v469_v55 = vadd.f32 %v468_v54, %v464_v50 }
 0x315   :  { %v457_v58 = vpop.f32.mrf.mxu2  ;;  %470 = vadd.xlane.f32.xlu2 %v469_v55  ;;  %v525_v55 = vld [vmem:[%s1349_s8 + $0x8] sm:$0xff]  ;;  %s1006_s8 = smov 48  }
 0x316   :  { %v463_v59 = vadd.f32 %v457_v58, %v392_v56 }
 0x318   :  { %v467_v60 = vmax.f32 %v463_v59, 0.0 }
 0x31a   :  { %v472_v62 = vsel %vm333_vm6, %v467_v60, 0.0 }
 0x31b   :  { %v473_v63 = vadd.f32 %v472_v62, %v466_v61 }
 0x31d   :  { %474 = vadd.xlane.f32.xlu1 %v473_v63 }
 0x336   :  { %551 = vperm.xlu1 %958, %v1185_v0  }
 0x388   :  { %v471_v1 = vpop.xlane.xlu2 %470 }
 0x389   :  { %v476_v2 = vmul.f32 0.0034722222, %v471_v1 }
 0x38b   :  { %v1188_v3 = vsub.f32 %v464_v50, %v476_v2  ;;  %v1190_v4 = vsub.f32 %v465_v48, %v476_v2  ;;  %v494_v17 = vmul.f32 %v476_v2, %v476_v2 }
 0x38d   :  { %v482_v5 = vmul.f32 %v1188_v3, %v1188_v3  ;;  %v483_v6 = vmul.f32 %v1190_v4, %v1190_v4  ;;  %v496_v18 = vmul.f32 64.0, %v494_v17 }
 0x38f   :  { %v486_v7 = vsel %vm333_vm6, %v483_v6, 0.0 }
 0x390   :  { %v475_v8 = vpop.xlane.xlu1 %474  ;;  %v487_v9 = vadd.f32 %v486_v7, %v482_v5 }
 0x391   :  { %v1197_v10 = vmul.f32 0.0034722222, %v475_v8 }
 0x392   :  { %488 = vadd.xlane.f32.xlu0 %v487_v9 }
 0x393   :  { %v1200_v11 = vsub.f32 %v466_v61, %v1197_v10  ;;  %v1203_v12 = vsub.f32 %v467_v60, %v1197_v10  ;;  %v495_v22 = vmul.f32 %v1197_v10, %v1197_v10 }
 0x395   :  { %v484_v13 = vmul.f32 %v1200_v11, %v1200_v11  ;;  %v485_v14 = vmul.f32 %v1203_v12, %v1203_v12  ;;  %v497_v24 = vmul.f32 64.0, %v495_v22 }
 0x397   :  { %v490_v15 = vsel %vm333_vm6, %v485_v14, 0.0  ;;  %vm750_vm6 = vcmask 1043456  }
 0x398   :  { %v491_v16 = vadd.f32 %v490_v15, %v484_v13 }
 0x39a   :  { %492 = vadd.xlane.f32.xlu0 %v491_v16 }
 0x405   :  { %v489_v19 = vpop.xlane.xlu0 %488 }
 0x406   :  { %v498_v20 = vadd.f32 %v496_v18, %v489_v19 }
 0x408   :  { %v500_v21 = vmul.f32 0.0034722222, %v498_v20 }
 0x40a   :  { %v502_v23 = vadd.f32 1e-05, %v500_v21 }
 0x40c   :  { %972 = vrsqrt.f32 %v502_v23  ;;  %vm510_vm9 = vweird.f32 %v502_v23 }
 0x40d   :  { %v493_v25 = vpop.xlane.xlu0 %492 }
 0x40e   :  { %v499_v26 = vadd.f32 %v497_v24, %v493_v25 }
 0x410   :  { %v501_v27 = vmul.f32 0.0034722222, %v499_v26 }
 0x412   :  { %v973_v28 = vpop.eup %972  ;;  %v503_v29 = vadd.f32 1e-05, %v501_v27 }
 0x413   :  { %v505_v30 = vmul.f32 %v973_v28, %v502_v23  ;;  %vm511_vm8 = vweird.f32 %v973_v28 }
 0x414   :  { %974 = vrsqrt.f32 %v503_v29  ;;  %vm512_vm10 = vmor %vm510_vm9, %vm511_vm8  ;;  %vm520_vm1 = vweird.f32 %v503_v29  ;;  %vm756_vm8 = vcmask 1045504   ;;  %vm759_vm9 = vcmask 1046528  }
 0x415   :  { %v506_v31 = vmul.f32 %v973_v28, %v505_v30 }
 0x417   :  { %v507_v32 = vmul.f32 0.5, %v506_v31 }
 0x419   :  { %v508_v33 = vsub.f32 1.5, %v507_v32 }
 0x41a   :  { %v975_v34 = vpop.eup %974 }
 0x41b   :  { %v515_v35 = vmul.f32 %v975_v34, %v503_v29  ;;  %v509_v36 = vmul.f32 %v973_v28, %v508_v33  ;;  %vm521_vm15 = vweird.f32 %v975_v34 }
 0x41c   :  { %vm522_vm2 = vmor %vm520_vm1, %vm521_vm15  ;;  %vm634_vm15 = vcmask 1047558   ;;  %vm642_vm1 = vcmask 785414  }
 0x41d   :  { %v516_v38 = vmul.f32 %v975_v34, %v515_v35  ;;  %v513_v39 = vsel %vm512_vm10, %v973_v28, %v509_v36  ;;  %vm570_vm10 = vcmask 779264  }
 0x41e   :  { %v526_v40 = vmul.f32 %v524_v37, %v513_v39 }
 0x41f   :  { %v517_v41 = vmul.f32 0.5, %v516_v38 }
 0x420   :  { %530 = vperm.xlu0 %957, %v526_v40   ;;  %v558_v43 = vmul.f32 %v526_v40, %v476_v2 }
 0x421   :  { %v518_v44 = vsub.f32 1.5, %v517_v41 }
 0x422   :  { %v560_v45 = vsub.f32 %v542_v42, %v558_v43 }
 0x423   :  { %v519_v46 = vmul.f32 %v975_v34, %v518_v44 }
 0x424   :  { %v579_v47 = vsel %vm578_vm11, %v560_v45, -inf  ;;  %v603_v48 = vsel %vm602_vm12, %v560_v45, -inf  ;;  %v627_v49 = vsel %vm626_vm13, %v560_v45, -inf  ;;  %v651_v50 = vsel %vm650_vm14, %v560_v45, -inf }
 0x425   :  { %v580_v51 = vrot.slane %v579_v47, 4  ;;  %v604_v52 = vrot.slane %v603_v48, 4  ;;  %v628_v53 = vrot.slane %v627_v49, 4  ;;  %v652_v54 = vrot.slane %v651_v50, 4 }
 0x426   :  { %v523_v56 = vsel %vm522_vm2, %v975_v34, %v519_v46  ;;  %vm819_vm2 = vcmask 523264  }
 0x427   :  { %v581_v57 = vmax.f32 %v579_v47, %v580_v51  ;;  %v605_v58 = vmax.f32 %v603_v48, %v604_v52  ;;  %v629_v59 = vmax.f32 %v627_v49, %v628_v53  ;;  %v653_v60 = vmax.f32 %v651_v50, %v652_v54 }
 0x428   :  { %546 = vperm.xlu0 %957, %v542_v42   ;;  %v527_v61 = vmul.f32 %v525_v55, %v523_v56 }
 0x429   :  { %v582_v62 = vrot.slane %v581_v57, 2  ;;  %v606_v63 = vrot.slane %v605_v58, 2  ;;  %v630_v1 = vrot.slane %v629_v59, 2  ;;  %v654_v8 = vrot.slane %v653_v60, 2 }
 0x42a   :  { %535 = vperm.xlu2 %959, %v527_v61   ;;  %v559_v2 = vmul.f32 %v527_v61, %v1197_v10 }
 0x42b   :  { %v583_v5 = vmax.f32 %v581_v57, %v582_v62  ;;  %v607_v6 = vmax.f32 %v605_v58, %v606_v63  ;;  %v631_v7 = vmax.f32 %v629_v59, %v630_v1  ;;  %v655_v21 = vmax.f32 %v653_v60, %v654_v8  ;;  %v552_v58 = vpop.permute.xlu1 %551 }
 0x42c   :  { %v561_v9 = vsub.f32 %v1185_v0, %v559_v2 }
 0x42d   :  { %v584_v13 = vrot.slane %v583_v5, 1  ;;  %v608_v14 = vrot.slane %v607_v6, 1  ;;  %v632_v20 = vrot.slane %v631_v7, 1  ;;  %v656_v30 = vrot.slane %v655_v21, 1 }
 0x42e   :  { %v672_v15 = vsel %vm578_vm11, %v561_v9, -inf  ;;  %v693_v16 = vsel %vm602_vm12, %v561_v9, -inf  ;;  %v714_v17 = vsel %vm626_vm13, %v561_v9, -inf  ;;  %v735_v18 = vsel %vm650_vm14, %v561_v9, -inf }
 0x42f   :  { %v585_v19 = vmax.f32 %v583_v5, %v584_v13  ;;  %v673_v10 = vrot.slane %v672_v15, 4  ;;  %v609_v22 = vmax.f32 %v607_v6, %v608_v14  ;;  %v694_v23 = vrot.slane %v693_v16, 4 }
 0x430   :  { %v715_v24 = vrot.slane %v714_v17, 4  ;;  %v736_v25 = vrot.slane %v735_v18, 4  ;;  %v633_v29 = vmax.f32 %v631_v7, %v632_v20  ;;  %v657_v42 = vmax.f32 %v655_v21, %v656_v30 }
 0x431   :  { %v674_v26 = vmax.f32 %v672_v15, %v673_v10  ;;  %v695_v0 = vmax.f32 %v693_v16, %v694_v23  ;;  %v762_v35 = vsel %vm742_vm3, %v585_v19, %v609_v22  ;;  %vm586_vm11 = vcmask 1043458  }
 0x432   :  { %v716_v27 = vmax.f32 %v714_v17, %v715_v24  ;;  %v737_v28 = vmax.f32 %v735_v18, %v736_v25  ;;  %v763_v41 = vsel %vm562_vm4, %v762_v35, %v633_v29  ;;  %vm594_vm12 = vcmask 781314  }
 0x433   :  { %v675_v31 = vrot.slane %v674_v26, 2  ;;  %v696_v32 = vrot.slane %v695_v0, 2  ;;  %v764_v48 = vsel %vm747_vm5, %v763_v41, %v657_v42  ;;  %vm610_vm13 = vcmask 1045508  }
 0x434   :  { %v717_v33 = vrot.slane %v716_v27, 2  ;;  %v738_v34 = vrot.slane %v737_v28, 2  ;;  %vm618_vm14 = vcmask 783364  }
 0x435   :  { %v676_v36 = vmax.f32 %v674_v26, %v675_v31  ;;  %v697_v37 = vmax.f32 %v695_v0, %v696_v32 }
 0x436   :  { %v718_v38 = vmax.f32 %v716_v27, %v717_v33  ;;  %v739_v39 = vmax.f32 %v737_v28, %v738_v34 }
 0x437   :  { %v677_v40 = vrot.slane %v676_v36, 1  ;;  %v698_v43 = vrot.slane %v697_v37, 1 }
 0x438   :  { %v719_v44 = vrot.slane %v718_v38, 1  ;;  %v740_v45 = vrot.slane %v739_v39, 1 }
 0x439   :  { %v678_v46 = vmax.f32 %v676_v36, %v677_v40  ;;  %v699_v47 = vmax.f32 %v697_v37, %v698_v43 }
 0x43a   :  { %v720_v49 = vmax.f32 %v718_v38, %v719_v44  ;;  %v741_v51 = vmax.f32 %v739_v39, %v740_v45 }
 0x43b   :  { %v765_v50 = vsel %vm750_vm6, %v764_v48, %v678_v46 }
 0x43c   :  { %v766_v52 = vsel %vm753_vm7, %v765_v50, %v699_v47 }
 0x43d   :  { %v767_v53 = vsel %vm756_vm8, %v766_v52, %v720_v49 }
 0x43e   :  { %v768_v54 = vsel %vm759_vm9, %v767_v53, %v741_v51 }
 0x43f   :  { %771 = vperm.xlu0 %957, %v768_v54  }
 0x484   :  { %v536_v55 = vpop.permute.xlu2 %535 }
 0x485   :  { %v540_v56 = vmul.f32 %v536_v55, %v1200_v11  ;;  %v541_v57 = vmul.f32 %v536_v55, %v1203_v12 }
 0x487   :  { %v556_v59 = vadd.f32 %v552_v58, %v540_v56  ;;  %v557_v60 = vadd.f32 %v552_v58, %v541_v57 }
 0x489   :  { %v658_v61 = vsel %vm562_vm4, %v556_v59, -inf  ;;  %v665_v62 = vsel %vm570_vm10, %v557_v60, -inf  ;;  %v679_v11 = vsel %vm586_vm11, %v556_v59, -inf  ;;  %v686_v12 = vsel %vm594_vm12, %v557_v60, -inf }
 0x48a   :  { %v659_v63 = vrot.slane %v658_v61, 4  ;;  %v666_v1 = vrot.slane %v665_v62, 4  ;;  %v700_v2 = vsel %vm610_vm13, %v556_v59, -inf  ;;  %v707_v5 = vsel %vm618_vm14, %v557_v60, -inf }
 0x48b   :  { %v721_v6 = vsel %vm634_vm15, %v556_v59, -inf  ;;  %v728_v7 = vsel %vm642_vm1, %v557_v60, -inf  ;;  %v680_v8 = vrot.slane %v679_v11, 4  ;;  %v687_v9 = vrot.slane %v686_v12, 4 }
 0x48c   :  { %v660_v13 = vmax.f32 %v658_v61, %v659_v63  ;;  %v667_v14 = vmax.f32 %v665_v62, %v666_v1  ;;  %v701_v15 = vrot.slane %v700_v2, 4  ;;  %v708_v16 = vrot.slane %v707_v5, 4 }
 0x48d   :  { %v722_v17 = vrot.slane %v721_v6, 4  ;;  %v729_v18 = vrot.slane %v728_v7, 4  ;;  %v681_v20 = vmax.f32 %v679_v11, %v680_v8  ;;  %v688_v21 = vmax.f32 %v686_v12, %v687_v9 }
 0x48e   :  { %v661_v10 = vrot.slane %v660_v13, 2  ;;  %v668_v22 = vrot.slane %v667_v14, 2  ;;  %v702_v23 = vmax.f32 %v700_v2, %v701_v15  ;;  %v709_v24 = vmax.f32 %v707_v5, %v708_v16 }
 0x48f   :  { %v723_v25 = vmax.f32 %v721_v6, %v722_v17  ;;  %v730_v26 = vmax.f32 %v728_v7, %v729_v18  ;;  %v682_v0 = vrot.slane %v681_v20, 2  ;;  %v689_v27 = vrot.slane %v688_v21, 2 }
 0x490   :  { %v1248_v28 = vmax.f32 %v660_v13, %v661_v10  ;;  %v1250_v29 = vmax.f32 %v667_v14, %v668_v22  ;;  %v703_v30 = vrot.slane %v702_v23, 2  ;;  %v710_v31 = vrot.slane %v709_v24, 2 }
 0x491   :  { %v724_v32 = vrot.slane %v723_v25, 2  ;;  %v731_v33 = vrot.slane %v730_v26, 2  ;;  %v1254_v36 = vmax.f32 %v681_v20, %v682_v0  ;;  %v1256_v37 = vmax.f32 %v688_v21, %v689_v27 }
 0x492   :  { %v531_v19 = vpop.permute.xlu0 %530  ;;  %v663_v39 = vrot.slane %v1248_v28, 1  ;;  %v670_v40 = vrot.slane %v1250_v29, 1  ;;  %v1260_v43 = vmax.f32 %v702_v23, %v703_v30  ;;  %v1262_v44 = vmax.f32 %v709_v24, %v710_v31 }
 0x493   :  { %v538_v34 = vmul.f32 %v531_v19, %v1188_v3  ;;  %v539_v35 = vmul.f32 %v531_v19, %v1190_v4  ;;  %v1264_v45 = vmax.f32 %v723_v25, %v724_v32  ;;  %v1266_v3 = vmax.f32 %v730_v26, %v731_v33 }
 0x49a   :  { %v547_v38 = vpop.permute.xlu0 %546 }
 0x49b   :  { %v554_v41 = vadd.f32 %v547_v38, %v538_v34  ;;  %v555_v42 = vadd.f32 %v547_v38, %v539_v35 }
 0x49d   :  { %v563_v4 = vsel %vm562_vm4, %v554_v41, -inf  ;;  %v571_v46 = vsel %vm570_vm10, %v555_v42, -inf  ;;  %v587_v47 = vsel %vm586_vm11, %v554_v41, -inf  ;;  %v595_v48 = vsel %vm594_vm12, %v555_v42, -inf }
 0x49e   :  { %v564_v49 = vrot.slane %v563_v4, 4  ;;  %v572_v50 = vrot.slane %v571_v46, 4  ;;  %v588_v51 = vrot.slane %v587_v47, 4  ;;  %v596_v52 = vrot.slane %v595_v48, 4 }
 0x49f   :  { %v611_v53 = vsel %vm610_vm13, %v554_v41, -inf  ;;  %v619_v54 = vsel %vm618_vm14, %v555_v42, -inf  ;;  %v635_v55 = vsel %vm634_vm15, %v554_v41, -inf  ;;  %v643_v56 = vsel %vm642_vm1, %v555_v42, -inf }
 0x4a0   :  { %v565_v57 = vmax.f32 %v563_v4, %v564_v49  ;;  %v573_v58 = vmax.f32 %v571_v46, %v572_v50  ;;  %v589_v59 = vmax.f32 %v587_v47, %v588_v51  ;;  %v597_v60 = vmax.f32 %v595_v48, %v596_v52 }
 0x4a1   :  { %v612_v61 = vrot.slane %v611_v53, 4  ;;  %v620_v62 = vrot.slane %v619_v54, 4  ;;  %v636_v63 = vrot.slane %v635_v55, 4  ;;  %v644_v1 = vrot.slane %v643_v56, 4 }
 0x4a2   :  { %v566_v11 = vrot.slane %v565_v57, 2  ;;  %v574_v12 = vrot.slane %v573_v58, 2  ;;  %v590_v2 = vrot.slane %v589_v59, 2  ;;  %v598_v5 = vrot.slane %v597_v60, 2 }
 0x4a3   :  { %v613_v6 = vmax.f32 %v611_v53, %v612_v61  ;;  %v621_v7 = vmax.f32 %v619_v54, %v620_v62  ;;  %v637_v8 = vmax.f32 %v635_v55, %v636_v63  ;;  %v645_v9 = vmax.f32 %v643_v56, %v644_v1 }
 0x4a4   :  { %v567_v13 = vmax.f32 %v565_v57, %v566_v11  ;;  %v575_v14 = vmax.f32 %v573_v58, %v574_v12  ;;  %v591_v15 = vmax.f32 %v589_v59, %v590_v2  ;;  %v599_v16 = vmax.f32 %v597_v60, %v598_v5 }
 0x4a5   :  { %v614_v17 = vrot.slane %v613_v6, 2  ;;  %v622_v18 = vrot.slane %v621_v7, 2  ;;  %v638_v19 = vrot.slane %v637_v8, 2  ;;  %v646_v20 = vrot.slane %v645_v9, 2 }
 0x4a6   :  { %v568_v21 = vrot.slane %v567_v13, 1  ;;  %v576_v10 = vrot.slane %v575_v14, 1  ;;  %v592_v22 = vrot.slane %v591_v15, 1  ;;  %v600_v23 = vrot.slane %v599_v16, 1 }
 0x4a7   :  { %v615_v24 = vmax.f32 %v613_v6, %v614_v17  ;;  %v623_v25 = vmax.f32 %v621_v7, %v622_v18  ;;  %v639_v26 = vmax.f32 %v637_v8, %v638_v19  ;;  %v647_v0 = vmax.f32 %v645_v9, %v646_v20  ;;  %v893_v18 = vld [vmem:[%s1352_s11] sm:$0x3] }
 0x4a8   :  { %v569_v27 = vmax.f32 %v567_v13, %v568_v21  ;;  %v577_v30 = vmax.f32 %v575_v14, %v576_v10  ;;  %v593_v31 = vmax.f32 %v591_v15, %v592_v22  ;;  %v601_v32 = vmax.f32 %v599_v16, %v600_v23 }
 0x4a9   :  { %v616_v33 = vrot.slane %v615_v24, 1  ;;  %v624_v34 = vrot.slane %v623_v25, 1  ;;  %v640_v35 = vrot.slane %v639_v26, 1  ;;  %v648_v38 = vrot.slane %v647_v0, 1 }
 0x4aa   :  { %v684_v41 = vrot.slane %v1254_v36, 1  ;;  %v743_v42 = vsel %vm742_vm3, %v569_v27, %v593_v31  ;;  %v691_v4 = vrot.slane %v1256_v37, 1  ;;  %v744_v46 = vsel %vm742_vm3, %v577_v30, %v601_v32  ;;  %v843_v27 = vld [vmem:[%s1353_s12] sm:$0xff] }
 0x4ab   :  { %v617_v47 = vmax.f32 %v615_v24, %v616_v33  ;;  %v625_v48 = vmax.f32 %v623_v25, %v624_v34  ;;  %v705_v49 = vrot.slane %v1260_v43, 1  ;;  %v712_v50 = vrot.slane %v1262_v44, 1  ;;  %v818_v24 = vld [vmem:[%s1351_s10] sm:$0xf]  ;;  %v846_v25 = vld [vmem:[%s1354_s13 + $0x8] sm:$0xff] }
 0x4ac   :  { %v641_v51 = vmax.f32 %v639_v26, %v640_v35  ;;  %v649_v52 = vmax.f32 %v647_v0, %v648_v38  ;;  %v726_v53 = vrot.slane %v1264_v45, 1  ;;  %v733_v54 = vrot.slane %v1266_v3, 1  ;;  %v845_v26 = vld [vmem:[%s1354_s13] sm:$0xff]  ;;  %v844_v0 = vld [vmem:[%s1353_s12 + $0x8] sm:$0xff]  ;;  %s910_s12 = sshll.u32 %s1009_s3, 4  ;;  %s911_s12 = int_to_ptr.vmem [resolvable:$true] %s910_s12 }
 0x4ad   :  { %v664_v55 = vmax.f32 %v1248_v28, %v663_v39  ;;  %v671_v56 = vmax.f32 %v1250_v29, %v670_v40  ;;  %v745_v57 = vsel %vm562_vm4, %v743_v42, %v617_v47  ;;  %v746_v58 = vsel %vm562_vm4, %v744_v46, %v625_v48  ;;  %887 = vmatpush.msrb.mxu0 %v844_v0  ;;  %v901_v34 = vld [vmem:[%s1355_s14] sm:$0x3] }
 0x4ae   :  { %v685_v59 = vmax.f32 %v1254_v36, %v684_v41  ;;  %v692_v60 = vmax.f32 %v1256_v37, %v691_v4  ;;  %v748_v61 = vsel %vm747_vm5, %v745_v57, %v641_v51  ;;  %v749_v62 = vsel %vm747_vm5, %v746_v58, %v649_v52 }
 0x4af   :  { %v706_v63 = vmax.f32 %v1260_v43, %v705_v49  ;;  %v713_v28 = vmax.f32 %v1262_v44, %v712_v50  ;;  %v751_v39 = vsel %vm750_vm6, %v748_v61, %v664_v55  ;;  %v752_v29 = vsel %vm750_vm6, %v749_v62, %v671_v56  ;;  %888 = vmatpush.msrb.mxu0 %v843_v27 }
 0x4b0   :  { %v727_v40 = vmax.f32 %v1264_v45, %v726_v53  ;;  %v734_v1 = vmax.f32 %v1266_v3, %v733_v54  ;;  %v754_v36 = vsel %vm753_vm7, %v751_v39, %v685_v59  ;;  %v755_v37 = vsel %vm753_vm7, %v752_v29, %v692_v60 }
 0x4b1   :  { %v757_v11 = vsel %vm756_vm8, %v754_v36, %v706_v63  ;;  %v758_v12 = vsel %vm756_vm8, %v755_v37, %v713_v28  ;;  %v772_v45 = vpop.permute.xlu0 %771  ;;  %v902_v42 = vmul.f32 10000000.0, %v901_v34 }
 0x4b2   :  { %v760_v43 = vsel %vm759_vm9, %v757_v11, %v727_v40  ;;  %v761_v44 = vsel %vm759_vm9, %v758_v12, %v734_v1 }
 0x4b3   :  { %785 = vrot.lane.b32.xlu0 %v761_v44, %s1003_s22  ;;  %780 = vrot.lane.b32.xlu1 %v760_v43, %s1005_s27  ;;  %v795_v3 = vmax.f32 %v761_v44, %v772_v45  ;;  %v774_v23 = vmax.f32 %v760_v43, %v772_v45 }
 0x4b4   :  { %776 = vrot.lane.b32.xlu2 %v760_v43, %s1003_s22 }
 0x4bb   :  { %789 = vrot.lane.b32.xlu0 %v761_v44, %s1005_s27 }
 0x4c3   :  { %815 = vrot.lane.b32.xlu0 %v795_v3, %s1006_s8 }
 0x50e   :  { %v777_v13 = vpop.permute.xlu2 %776 }
 0x50f   :  { %v779_v15 = vmax.f32 %v760_v43, %v777_v13 }
 0x525   :  { %v786_v2 = vpop.permute.xlu0 %785  ;;  %v781_v14 = vpop.permute.xlu1 %780 }
 0x526   :  { %v788_v5 = vmax.f32 %v760_v43, %v786_v2  ;;  %v793_v6 = vmax.f32 %v761_v44, %v786_v2  ;;  %v783_v17 = vmax.f32 %v779_v15, %v781_v14 }
 0x52d   :  { %v790_v7 = vpop.permute.xlu0 %789 }
 0x52e   :  { %v792_v8 = vmax.f32 %v788_v5, %v790_v7  ;;  %v794_v9 = vmax.f32 %v793_v6, %v790_v7 }
 0x530   :  { %808 = vrot.lane.b32.xlu1 %v794_v9, %s1003_s22  ;;  %811 = vrot.lane.b32.xlu2 %v794_v9, %s1004_s4 }
 0x531   :  { %804 = vrot.lane.b32.xlu0 %v792_v8, %s1007_s29 }
 0x535   :  { %v816_v16 = vpop.permute.xlu0 %815 }
 0x536   :  { %831 = vmatpush.msra.mxu3 %v816_v16 }
 0x538   :  { %797 = vrot.lane.b32.xlu1 %v783_v17, %s1005_s27  ;;  %800 = vrot.lane.b32.xlu2 %v783_v17, %s1008_s16 }
 0x539   :  { %896 = vperm.xlu0 %957, %v893_v18  }
 0x58a   :  { %v812_v19 = vpop.permute.xlu2 %811 }
 0x58b   :  { %832 = vmatpush.msra.mxu3 %v812_v19 }
 0x592   :  { %v801_v10 = vpop.permute.xlu2 %800 }
 0x5a2   :  { %v809_v20 = vpop.permute.xlu1 %808 }
 0x5a3   :  { %833 = vmatpush.msra.mxu3 %v809_v20  ;;  %v805_v21 = vpop.permute.xlu0 %804 }
 0x5a5   :  { %834 = vmatpush.msra.mxu3 %v805_v21 }
 0x5a7   :  { %835 = vmatpush.msra.mxu3 %v801_v10 }
 0x5aa   :  { %v798_v22 = vpop.permute.xlu1 %797 }
 0x5ab   :  { %836 = vmatpush.msra.mxu3 %v798_v22  ;;  %v897_v38 = vpop.permute.xlu0 %896 }
 0x5ad   :  { %837 = vmatpush.msra.mxu3 %v783_v17 }
 0x5af   :  { %838 = vmatpush.msra.mxu3 %v774_v23 }
 0x5b0   :  { %946 = vmatmul.msk.f32.vlgmr.msra.gmra.mxu3 %vm819_vm2, %v818_v24 }
 0x5b1   :  { %865 = vmatpush.msrb.mxu3 %v846_v25 }
 0x5b3   :  { %866 = vmatpush.msrb.mxu3 %v845_v26 }
 0x633   :  { %v840_v30 = vpop.f32.mrf.mxu3 }
 0x634   :  { %v848_v31 = vrot.slane %v840_v30, 2  ;;  %948 = vmatmul.msk.f32.vlgmr.msrb.gmra.mxu0 %vm75_vm0, %v840_v30 }
 0x636   :  { %947 = vmatmul.msk.f32.vlgmr.msrb.gmra.mxu3 %vm75_vm0, %v848_v31 }
 0x6b1   :  { %v890_v33 = vpop.f32.mrf.mxu0 }
 0x6b9   :  { %v868_v32 = vpop.f32.mrf.mxu3 }
 0x6ba   :  { %v891_v35 = vadd.f32 %v890_v33, %v868_v32 }
 0x6bc   :  { %v899_v41 = vadd.f32 %v897_v38, %v891_v35 }
 0x6be   :  { %v900_v4 = vmax.f32 %v899_v41, 0.0 }
 0x6c0   :  { %v903_v46 = vadd.f32 %v902_v42, %v900_v4 }
 0x6c2   :  { %904 = vst [vmem:[#allocation2] sm:$0x3] %v903_v46 }
 0x6c3   :  { %915 = dma.vmem_to_hbm [thread:$0]  %s911_s12, 32, %s913_s6, [#allocation3]  }
 0x6c4   :  { %1000 = dma.done.wait [#allocation3], 32  }
 0x6c5   :  { %1001 = vsyncadd [#allocation3], 4294967264 }
 0x6c6   :  { %920 = vsyncpa [#allocation3], 1 }

</bundles_post_ra>
